<compile_context>
chip_gen: v5e
topology: v5e:2x2
jax: 0.10.0
libtpu: 0.0.40
codegen_flags: <defaults>
</compile_context>

<pallas_src>
import jax
import jax.numpy as jnp
from jax.experimental import pallas as pl
from jax.experimental.pallas import tpu as pltpu


# ---------------------------------------------------------------------------
# Small helpers
# ---------------------------------------------------------------------------
def _cdiv(a, b):
    return -(-a // b)


def _round_up(a, m):
    return _cdiv(a, m) * m


def _sublane(dtype):
    # (sublane, lane) tiling: (8,128) f32, (16,128) bf16, (32,128) int8/fp8.
    return {4: 8, 2: 16, 1: 32}.get(jnp.dtype(dtype).itemsize, 8)


def _vmem_budgets():
    """Return (double_buffered_working_set_budget, vmem_limit_bytes)."""
    cap = 0
    try:
        cap = int(getattr(pltpu.get_tpu_info(), "vmem_capacity_bytes", 0) or 0)
    except Exception:
        cap = 0
    if cap >= 100 * 1024 * 1024:            # v5e / v6e class: 128 MiB VMEM
        work, limit = 56 * 1024 * 1024, 88 * 1024 * 1024
    else:                                    # v7x class (64 MiB / TC) or unknown
        work, limit = 26 * 1024 * 1024, 40 * 1024 * 1024
    if cap:
        limit = min(limit, max(cap - 8 * 1024 * 1024, 16 * 1024 * 1024))
        work = min(work, max(limit - 6 * 1024 * 1024, 8 * 1024 * 1024))
    return work, limit


# ---------------------------------------------------------------------------
# Tile selection (fail-safe, budget- and dtype-aware)
# ---------------------------------------------------------------------------
def _pick_tiles_matvec(B, K, itemsize, sub, work, block_b=None, block_k=None):
    """Pick (batch_tile, k_tile) for the flattened (B, K) matvec."""
    B_cap = _round_up(B, sub)

    def w_bytes(tk):                       # (1, tk) f32 weight buffer (8-sublane pad)
        return 8 * _round_up(tk, 128) * 4

    def need(tb, tk):                      # 2x x buffers + 2x w buffers + out/acc pads
        return 2 * tb * tk * itemsize + 2 * w_bytes(tk) + 3 * tb * 128 * 4

    # ---- reduction (K) tile ----
    if block_k is not None:
        tk = K if block_k >= K else max(128, (block_k // 128) * 128)
    elif need(sub, K) <= work:
        tk = K                             # whole reduction dim per block
    else:                                  # K-reduction grid axis needed
        tb_probe = block_b if block_b is not None else min(B_cap, 256)
        tb_probe = max(sub, (min(tb_probe, B_cap) // sub) * sub)
        tk = (work - 3 * tb_probe * 128 * 4) // (2 * tb_probe * itemsize + 64)
        tk = max(128, (tk // 128) * 128)
        if tk >= K:
            tk = K

    # ---- batch tile ----
    if block_b is not None:
        tb = max(sub, _round_up(min(block_b, B_cap), sub))
    else:
        tb = sub
        while tb * 2 <= B_cap and need(tb * 2, tk) <= work:
            tb *= 2
        tb = min(tb, B_cap)
        # Keep both v7x TensorCores busy: >=2 batch grid steps whenever B allows.
        if B > sub and _cdiv(B, tb) < 2:
            tb = max(sub, _round_up(_cdiv(B, 2), sub))
    return tb, tk


def _pick_tile_indep(B, L, we, itemsize, sub, work, block_b=None):
    """Pick the batch tile for the (B, L, we) slab kernel."""
    B_cap = _round_up(B, sub)
    row = _round_up(L, 8) * _round_up(we, 128) * itemsize   # padded VMEM bytes / row
    w_buf = _round_up(L, 8) * 128 * 4

    def need(tb):
        return 2 * tb * row + 2 * w_buf + 2 * tb * 128 * 4

    if block_b is not None:
        return max(sub, _round_up(min(block_b, B_cap), sub))
    tb = sub
    while tb * 2 <= B_cap and need(tb * 2) <= work:
        tb *= 2
    tb = min(tb, B_cap)
    if B > sub and _cdiv(B, tb) < 2:
        tb = max(sub, _round_up(_cdiv(B, 2), sub))
    return tb


# ---------------------------------------------------------------------------
# independent=False path  -> returns shape (B,)
# ---------------------------------------------------------------------------
def nlinear_dep(x, w_flat, bias, prediction_idx, *, block_b=None, block_k=None):
    B, L, E = x.shape
    K = L * E
    p = int(prediction_idx)

    # Exact fold of the seq_last normalization + pred-column add-back into w.
    w2d = w_flat.reshape(L, E).astype(jnp.float32)
    w_adj = w2d.at[L - 1, :].add(-jnp.sum(w2d, axis=0))
    w_adj = w_adj.at[L - 1, p].add(1.0)
    w_row = w_adj.reshape(1, K)                       # lane-dense (1, K) weight
    bias_arr = jnp.asarray(bias, jnp.float32).reshape(1)

    x2d = x.reshape(B, K)                             # free row-major reshape

    itemsize = x2d.dtype.itemsize
    sub = _sublane(x2d.dtype)
    work, limit = _vmem_budgets()
    tb, tk = _pick_tiles_matvec(B, K, itemsize, sub, work, block_b, block_k)

    nb = _cdiv(B, tb)
    nk = _cdiv(K, tk)
    k_pad = nk * tk
    if k_pad != K:
        # Zero-pad the tiny weight so the (masked) K tail multiplies zeros.
        w_row = jnp.pad(w_row, ((0, 0), (0, k_pad - K)))
    needs_mask = (K % tk) != 0

    def kernel(x_ref, w_ref, b_ref, o_ref, *acc):
        xt = x_ref[...].astype(jnp.float32)                         # (tb, tk)
        if needs_mask:
            col = (jax.lax.broadcasted_iota(jnp.int32, xt.shape, 1)
                   + pl.program_id(1) * tk)
            xt = jnp.where(col < K, xt, 0.0)                        # stale-VMEM tail -> 0
        # VPU multiply (sublane-broadcast of the (1, tk) weight) + lane reduce.
        part = jnp.sum(xt * w_ref[...], axis=-1, keepdims=True)     # (tb, 1) f32
        if nk == 1:
            o_ref[...] = (part + b_ref[0]).astype(o_ref.dtype)
        else:
            acc_ref = acc[0]

            @pl.when(pl.program_id(1) == 0)
            def _init():
                acc_ref[...] = jnp.zeros_like(acc_ref)

            acc_ref[...] += part

            @pl.when(pl.program_id(1) == nk - 1)
            def _finalize():
                o_ref[...] = (acc_ref[...] + b_ref[0]).astype(o_ref.dtype)

    scratch = [] if nk == 1 else [pltpu.VMEM((tb, 1), jnp.float32)]

    out = pl.pallas_call(
        kernel,
        out_shape=jax.ShapeDtypeStruct((B, 1), x.dtype),
        grid=(nb, nk),
        in_specs=[
            pl.BlockSpec((tb, tk), lambda i, k: (i, k)),   # streamed x tile
            pl.BlockSpec((1, tk), lambda i, k: (0, k)),    # lane-dense folded weight
            pl.BlockSpec(memory_space=pltpu.SMEM),         # bias scalar
        ],
        out_specs=pl.BlockSpec((tb, 1), lambda i, k: (i, 0)),
        scratch_shapes=scratch,
        compiler_params=pltpu.CompilerParams(
            dimension_semantics=("parallel", "arbitrary"),
            vmem_limit_bytes=limit,
        ),
        cost_estimate=pl.CostEstimate(
            flops=2 * B * K,
            bytes_accessed=itemsize * B * K + 4 * k_pad + itemsize * B,
            transcendentals=0,
        ),
    )(x2d, w_row, bias_arr)
    # PyTorch returns x.squeeze(); for B > 1 that is (B,).
    return out.squeeze()


# ---------------------------------------------------------------------------
# independent=True path  -> returns shape (B,)
# ---------------------------------------------------------------------------
def nlinear_indep(x, w, bias, prediction_idx, *, block_b=None):
    B, L, E = x.shape
    p = int(prediction_idx)

    # Fold:  y = dot(xp, w_adj) + bias   with  w_adj[L-1] = w[L-1] + 1 - sum(w)
    w1 = w.reshape(L).astype(jnp.float32)
    w_adj = w1.at[L - 1].add(1.0 - jnp.sum(w1))
    w_col = w_adj.reshape(L, 1)
    bias_arr = jnp.asarray(bias, jnp.float32).reshape(1)

    # Only DMA the aligned 128-wide E slab containing prediction_idx (any E):
    # the block is clipped at the array edge, and only the valid lane is read.
    if E >= 128:
        we, e_blk, lane = 128, p // 128, p % 128
    else:
        we, e_blk, lane = E, 0, p

    itemsize = x.dtype.itemsize
    sub = _sublane(x.dtype)
    work, limit = _vmem_budgets()
    tb = _pick_tile_indep(B, L, we, itemsize, sub, work, block_b)
    nb = _cdiv(B, tb)

    def kernel(x_ref, w_ref, b_ref, o_ref):
        xs = x_ref[...].astype(jnp.float32)                     # (tb, L, we)
        # Reduce at full slab width (no lane-sparse intermediate), then pick
        # the prediction lane from the small (tb, we) result.
        red = jnp.sum(xs * w_ref[...][None, :, :], axis=1)      # (tb, we) f32
        o_ref[...] = (red[:, lane:lane + 1] + b_ref[0]).astype(o_ref.dtype)

    out = pl.pallas_call(
        kernel,
        out_shape=jax.ShapeDtypeStruct((B, 1), x.dtype),
        grid=(nb,),
        in_specs=[
            pl.BlockSpec((tb, L, we), lambda i: (i, 0, e_blk)),  # just the needed slab
            pl.BlockSpec((L, 1), lambda i: (0, 0)),              # tiny folded weight
            pl.BlockSpec(memory_space=pltpu.SMEM),               # bias scalar
        ],
        out_specs=pl.BlockSpec((tb, 1), lambda i: (i, 0)),
        compiler_params=pltpu.CompilerParams(
            dimension_semantics=("parallel",),
            vmem_limit_bytes=limit,
        ),
        cost_estimate=pl.CostEstimate(
            flops=2 * B * L * we,
            bytes_accessed=itemsize * B * L * we + 4 * L + itemsize * B,
            transcendentals=0,
        ),
    )(x, w_col, bias_arr)
    return out.squeeze()


# ---------------------------------------------------------------------------
# Pure-JAX references (mirror the PyTorch forward exactly)
# ---------------------------------------------------------------------------
def ref_dep(x, w_flat, bias, prediction_idx):
    seq_last = x[:, -1:, :]
    xc = (x - seq_last).reshape(x.shape[0], -1)
    y = xc @ w_flat.reshape(-1, 1) + bias
    y = y + seq_last[:, :, prediction_idx]
    return y.squeeze()


def ref_indep(x, w, bias, prediction_idx):
    xp = x[:, :, prediction_idx]
    seq_last = xp[:, -1:]
    y = (xp - seq_last) @ w.reshape(-1, 1) + bias
    y = y + seq_last
    return y.squeeze()


if __name__ == "__main__":
    prediction_idx = 3
    B, L, E = 16, 8, 32           # batch, sequence_length, embedding_dim

    key = jax.random.PRNGKey(0)
    kx, kw1, kb1, kw2, kb2, kx2, kx3, kw3 = jax.random.split(key, 8)

    x = jax.random.normal(kx, (B, L, E), dtype=jnp.float32)
    # nn.Linear parameter shapes: dep -> weight (1, L*E), bias (1,);
    #                             indep -> weight (1, L),  bias (1,)
    w_dep = jax.random.normal(kw1, (L * E,), dtype=jnp.float32) * 0.05
    b_dep = jax.random.normal(kb1, (1,), dtype=jnp.float32) * 0.05
    w_ind = jax.random.normal(kw2, (L,), dtype=jnp.float32) * 0.05
    b_ind = jax.random.normal(kb2, (1,), dtype=jnp.float32) * 0.05

    # 1) independent=False, auto tiling (single K tile, >=2 batch tiles).
    y_dep = jax.block_until_ready(nlinear_dep(x, w_dep, b_dep, prediction_idx))
    r_dep = ref_dep(x, w_dep, b_dep, prediction_idx)
    assert y_dep.shape == (B,)
    assert jnp.allclose(y_dep, r_dep, atol=1e-4, rtol=1e-4)

    # 2) independent=False, forced K-reduction grid (accumulator + pl.when path).
    y_dep2 = jax.block_until_ready(
        nlinear_dep(x, w_dep, b_dep, prediction_idx, block_b=8, block_k=128))
    assert jnp.allclose(y_dep2, r_dep, atol=1e-4, rtol=1e-4)

    # 3) independent=False, K not a multiple of the K tile (tail-mask path).
    E3 = 33
    x3 = jax.random.normal(kx3, (B, L, E3), dtype=jnp.float32)
    w3 = jax.random.normal(kw3, (L * E3,), dtype=jnp.float32) * 0.05
    y_dep3 = jax.block_until_ready(
        nlinear_dep(x3, w3, b_dep, prediction_idx, block_k=128))
    r_dep3 = ref_dep(x3, w3, b_dep, prediction_idx)
    assert jnp.allclose(y_dep3, r_dep3, atol=1e-4, rtol=1e-4)

    # 4) independent=True, E < 128 (full-E slab).
    y_ind = jax.block_until_ready(nlinear_indep(x, w_ind, b_ind, prediction_idx))
    r_ind = ref_indep(x, w_ind, b_ind, prediction_idx)
    assert y_ind.shape == (B,)
    assert jnp.allclose(y_ind, r_ind, atol=1e-4, rtol=1e-4)

    # 5) independent=True, E % 128 != 0 and E >= 128: only one 128-wide slab is DMA'd.
    E5, p5 = 200, 150
    x5 = jax.random.normal(kx2, (B, L, E5), dtype=jnp.float32)
    y_ind5 = jax.block_until_ready(nlinear_indep(x5, w_ind, b_ind, p5))
    r_ind5 = ref_indep(x5, w_ind, b_ind, p5)
    assert jnp.allclose(y_ind5, r_ind5, atol=1e-4, rtol=1e-4)

    # 6) independent=True, E % 128 == 0.
    E6, p6 = 256, 140
    x6 = jax.random.normal(kx2, (B, L, E6), dtype=jnp.float32)
    y_ind6 = jax.block_until_ready(nlinear_indep(x6, w_ind, b_ind, p6))
    r_ind6 = ref_indep(x6, w_ind, b_ind, p6)
    assert jnp.allclose(y_ind6, r_ind6, atol=1e-4, rtol=1e-4)

    print("KERNEL_OK")
</pallas_src>

<mosaic_0001>
module attributes {stable_mosaic.version = 11 : i64} {
  func.func @kernel(%arg0: i32, %arg1: i32, %arg2: memref<8x256xf32, #tpu.memory_space<vmem>>, %arg3: memref<1x256xf32, #tpu.memory_space<vmem>>, %arg4: memref<1xf32, #tpu.memory_space<smem>>, %arg5: memref<8x1xf32, #tpu.memory_space<vmem>>) attributes {dimension_semantics = [#tpu.dimension_semantics<parallel>, #tpu.dimension_semantics<arbitrary>], iteration_bounds = array<i64: 2, 1>, scalar_prefetch = 0 : i64, scratch_operands = 0 : i64, tpu.core_type = #tpu.core_type<tc>, window_params = [{transform_indices = @transform_0, window_bounds = array<i64: 8, 256>}, {transform_indices = @transform_1, window_bounds = array<i64: 1, 256>}, {transform_indices = @transform_2, window_bounds = array<i64: 1>}, {transform_indices = @transform_3, window_bounds = array<i64: 8, 1>}]} {
    %c0 = arith.constant 0 : index
    %c0_0 = arith.constant 0 : index
    %0 = vector.load %arg2[%c0, %c0_0] : memref<8x256xf32, #tpu.memory_space<vmem>>, vector<8x256xf32>
    %c0_1 = arith.constant 0 : index
    %c0_2 = arith.constant 0 : index
    %1 = vector.load %arg3[%c0_1, %c0_2] : memref<1x256xf32, #tpu.memory_space<vmem>>, vector<1x256xf32>
    %2 = vector.broadcast %1 : vector<1x256xf32> to vector<8x256xf32>
    %3 = arith.mulf %0, %2 : vector<8x256xf32>
    %cst = arith.constant dense<0.000000e+00> : vector<8xf32>
    %4 = vector.multi_reduction <add>, %3, %cst [1] : vector<8x256xf32> to vector<8xf32>
    %5 = vector.shape_cast %4 : vector<8xf32> to vector<8x1xf32>
    %c0_3 = arith.constant 0 : index
    %6 = memref.load %arg4[%c0_3] : memref<1xf32, #tpu.memory_space<smem>>
    %7 = vector.broadcast %6 : f32 to vector<8x1xf32>
    %8 = arith.addf %5, %7 : vector<8x1xf32>
    %c0_4 = arith.constant 0 : index
    %c0_5 = arith.constant 0 : index
    %9 = vector.load %arg5[%c0_4, %c0_5] : memref<8x1xf32, #tpu.memory_space<vmem>>, vector<8x1xf32>
    tpu.vector_store %arg5[%c0_4, %c0_5], %8 {strides = array<i32>} : memref<8x1xf32, #tpu.memory_space<vmem>>, vector<8x1xf32>,
    return
  }
  func.func @transform_0(%arg0: i32, %arg1: i32) -> (i32, i32) {
    %c0_i32 = arith.constant 0 : i32
    return %arg0, %arg1 : i32, i32
  }
  func.func @transform_1(%arg0: i32, %arg1: i32) -> (i32, i32) {
    %c0_i32 = arith.constant 0 : i32
    %c0_i32_0 = arith.constant 0 : i32
    return %c0_i32, %arg1 : i32, i32
  }
  func.func @transform_2(%arg0: i32, %arg1: i32) -> i32 {
    %c0_i32 = arith.constant 0 : i32
    %c0_i32_0 = arith.constant 0 : i32
    return %c0_i32 : i32
  }
  func.func @transform_3(%arg0: i32, %arg1: i32) -> (i32, i32) {
    %c0_i32 = arith.constant 0 : i32
    %c0_i32_0 = arith.constant 0 : i32
    return %arg0, %c0_i32 : i32, i32
  }
}

</mosaic_0001>

<bundles_post_ra>
// kernel: tpu_custom_call.1
= control target key start
LH: loop header
LB: loop body
LE: loop exit
PB: predicated region body
PF: predicated region fallthrough
CT: control target
= control target key end

     0   :  { %s597_s0 = inlined_call_operand.hbm [shape: f32[16,256], index: 0, kind: input, shape index: {}]   ;;  %s598_s1 = inlined_call_operand.vmem [shape: f32[1,256], index: 1, kind: input, shape index: {}]   ;;  %s599_s2 = inlined_call_operand.<no memory space> [shape: f32[1], index: 2, kind: input, shape index: {}]   ;;  %s600_s3 = inlined_call_operand.vmem [shape: f32[16,1], index: 3, kind: output, shape index: {}]  }
   0x1   :  { %8 = sst [smem:[#allocation2]] %s599_s2 }
   0x2   :  { %9 = vsyncpa [#allocation4], 0 }
   0x3   :  { %11 = vsyncpa [#allocation4 + $0x1], 0  ;;  %s506_s14 = smov 0   ;;  %s508_s15 = smov 0  }
   0x4   :  { %s510_s16 = smov 0   ;;  %s512_s17 = smov 0  }
   0x5   :  { %s514_s18 = smov 0   ;;  %s516_s19 = smov 0  }
   0x6 LB: > { %s332_s2 = sadd.s32 4294967295, %s481_s19   ;;  %s29_s20 = sadd.s32 1, %s477_s18  ;;  %s481_s19 = sphi %s516_s19, %s17_s19   ;;  %s477_s18 = sphi %s514_s18, %s607_s18   ;;  %s473_s17 = sphi %s512_s17, %s606_s17   ;;  %s469_s16 = sphi %s510_s16, %s605_s16   ;;  %s465_s15 = sphi %s508_s15, %s604_s15   ;;  %s461_s14 = sphi %s506_s14, %s603_s14  }
   0x7   : > { %p31_p0 = scmp.ge.s32.totalorder %s29_s20, 2  ;;  %s38_s21 = sadd.s32 1, %s469_s16 }
   0x8   : > { %p45_p1 = scmp.ne.s32.totalorder %s469_s16, %s465_s15  ;;  %p46_p2 = scmp.eq.s32.totalorder %s481_s19, 0 }
   0x9   : > { %s609_s20 = smov (%p31_p0, %s29_s20), 0  ;;  %p51_p4 = scmp.ne.s32.totalorder %s465_s15, %s461_s14 }
   0xa   : > { %p542_p3 = por %p46_p2, %p45_p1  ;;  %s33_s23 = ssub.s32 %s477_s18, %s609_s20 }
   0xb   : > { %p52_p5 = scmp.eq.s32.totalorder %s332_s2, 0  ;;  %p36_p6 = scmp.eq.s32.totalorder %s33_s23, 0 }
   0xc   : > { %p352_p8 = scmp.lt.s32.totalorder %s481_s19, 2  ;;  %s159_s26 = sand.u32 1, %s469_s16  }
   0xd   : > { %p549_p7 = por %p52_p5, %p51_p4  ;;  %s345_s27 = sshll.u32 %s477_s18, 4 }
   0xe   : > { %s555_s25 = scalar_select %p36_p6, %s469_s16, %s38_s21  }
   0xf   : > { %s337_s28 = sshll.u32 %s159_s26, 4  ;;  %s170_s4 = scalar_lea.hbm %s597_s0, %s345_s27 }
  0x10   : > { %s172_s5 = sshll.u32 %s170_s4, 4  ;;  %s163_s6 = scalar_lea.vmem [#allocation3], %s337_s28  ;;  %s173_s5 = int_to_ptr.hbm [resolvable:$true] %s172_s5 }
  0x11   : > { %s174_s7 = sshll.u32 %s163_s6, 4  ;;  %p349_p9 = pnand %p352_p8, %p542_p3  ;;  %s175_s7 = int_to_ptr.vmem [resolvable:$true] %s174_s7 }
  0x12   : > { %p340_p10 = scmp.ge.s32.totalorder %s481_s19, 1  ;;  %p179_p11 = scmp.lt.s32.totalorder %s481_s19, 3 }
  0x13   : > { %s160_s8 = scalar_lea.sflag [#allocation4], %s159_s26 }
  0x14   : > { %351 = dma.hbm_to_vmem [thread:$0]  (!%p349_p9), %s173_s5, 256, %s175_s7, %s160_s8  }
  0x15   : > { %p180_p12 = pnand %p340_p10, %p179_p11 }
  0x16   : > { %s185_s9 = sand.u32 (!%p180_p12), 1, %s465_s15  }
  0x17   : > { %183 = sbr.rel (%p180_p12) target bundleno = 156 (0x9c), region = 32  ;;  %s341_s10 = sshll.u32 (!%p180_p12), %s185_s9, 4 }
  0x18   : > { %s186_s11 = scalar_lea.sflag (!%p180_p12), [#allocation4], %s185_s9  ;;  %s189_s12 = scalar_lea.vmem (!%p180_p12), [#allocation3], %s341_s10 }
  0x1c   : > { %456 = dma.done.wait (%p549_p7), %s186_s11, 256  }
  0x1d   : > { %458 = vsyncadd (%p549_p7), %s186_s11, 4294967040  ;;  %v226_v0 = vld [vmem:[%s189_s12] sm:$0xff]  ;;  %v227_v1 = vld [vmem:[%s189_s12 + $0x8] sm:$0xff]  ;;  %p222_p13 = scmp.lt.s32.totalorder %s473_s17, 1  ;;  %s239_s2 = sld [smem:[#allocation2]]  ;;  %vm242_vm0 = vcmask 7168  }
  0x1e   : > { %v228_v2 = vld [vmem:[%s598_s1] sm:$0x3] }
  0x1f   : > { %v230_v3 = vperm.slane %v228_v2, 0  ;;  %v231_v4 = vperm.slane %v228_v2, 1  ;;  %s611_s17 = smov (!%p222_p13, %s473_s17), 1 }
  0x20   : > { %s342_s21 = sshll.u32 %s611_s17, 3 }
  0x21   : > { %v234_v5 = vmul.f32 %v230_v3, %v226_v0  ;;  %v235_v6 = vmul.f32 %v231_v4, %v227_v1  ;;  %s225_s24 = scalar_lea.vmem %s600_s3, %s342_s21 }
  0x23   : > { %v236_v7 = vadd.f32 %v235_v6, %v234_v5  ;;  %v240_v8 = vstv %s239_s2 }
  0x25   : > { %237 = vadd.xlane.f32.xlu0 %v236_v7 }
  0x98   : > { %v238_v9 = vpop.xlane.xlu0 %237 }
  0x99   : > { %v241_v10 = vadd.f32 %v240_v8, %v238_v9 }
  0x9b   : > { %243 = vst.msk [vmem:[%s225_s24] sm:$0xff] %vm242_vm0, %v241_v10 }
  0x9c PF: > { %s17_s19 = sadd.s32 1, %s481_s19   ;;  %s603_s14 = smov %s465_s15 }
  0x9d   : > { %p14_p0 = scmp.ge.s32.totalorder %s17_s19, 4   ;;  %s604_s15 = smov %s469_s16 }
  0x9e   : > { %s605_s16 = smov %s555_s25  ;;  %s606_s17 = smov %s477_s18 }
  0x9f   : > { %s607_s18 = smov %s609_s20  ;;  %16 = sbr.rel (!%p14_p0) target bundleno = 6 (0x6), region = 75 }
  0xa4   :  { %263 = vsyncpa [#allocation4], 1 }
  0xa5   :  { %265 = vsyncpa [#allocation4 + $0x1], 1 }

</bundles_post_ra>
